<compile_context>
chip_gen: v7x
topology: tpu7x:2x2x1
jax: 0.10.0
libtpu: 0.0.40
codegen_flags: <defaults>
</compile_context>

<pallas_src>
import jax
import jax.numpy as jnp
from jax.experimental import pallas as pl
from jax.experimental.pallas import tpu as pltpu


# --------------------------------------------------------------------------
# Fused kernel: conv1x1 + folded BN + ReLU -> folded(fc1, fc2) -> tanh
# --------------------------------------------------------------------------
def _value_head_kernel(x_ref, wc_ref, shift_ref, w12_ref, b12_ref, o_ref):
    # x_ref    : (B, C, S) VMEM  input, S = H*W, free reshape of NCHW
    # wc_ref   : (1, C)    VMEM  conv weight row with BN scale folded in
    # shift_ref: (1,)      SMEM  conv bias + BN shift (scalar, since F == 1)
    # w12_ref  : (1, S)    VMEM  folded fc2 @ fc1 weight row
    # b12_ref  : (1,)      SMEM  folded fc2 @ fc1_b + fc2_b (scalar)
    # o_ref    : (B, 1)    VMEM  output
    B = x_ref.shape[0]
    wc = wc_ref[...]          # (1, C)
    w12 = w12_ref[...]        # (1, S)
    shift = shift_ref[0]
    b12 = b12_ref[0]

    # B is small & static -> unrolled. For large B this loop would become a
    # "parallel" grid axis instead of a Python loop.
    for b in range(B):
        # 1x1 conv (out_channels == 1): channel contraction on the MXU.
        g = jnp.dot(wc, x_ref[b], preferred_element_type=jnp.float32)   # (1, S)
        # Folded BN shift + ReLU.  PyTorch's x.view(B, -1) is the identity
        # flatten here because out_channels == 1, so g is already flat.
        f = jnp.maximum(g + shift, 0.0)                                  # (1, S)
        # Folded fc1+fc2 (affine of affine): a single lane reduce, then tanh.
        v = jnp.sum(f * w12, axis=-1, keepdims=True) + b12               # (1, 1)
        o_ref[pl.ds(b, 1), :] = jnp.tanh(v)


def value_head_pallas(x_bcs, wc_row, shift, w12_row, b12):
    B = x_bcs.shape[0]
    return pl.pallas_call(
        _value_head_kernel,
        out_shape=jax.ShapeDtypeStruct((B, 1), jnp.float32),
        in_specs=[
            pl.BlockSpec(memory_space=pltpu.MemorySpace.VMEM),   # x (B, C, S)
            pl.BlockSpec(memory_space=pltpu.MemorySpace.VMEM),   # wc (1, C)
            pl.BlockSpec(memory_space=pltpu.MemorySpace.SMEM),   # shift (1,)
            pl.BlockSpec(memory_space=pltpu.MemorySpace.VMEM),   # w12 (1, S)
            pl.BlockSpec(memory_space=pltpu.MemorySpace.SMEM),   # b12 (1,)
        ],
        out_specs=pl.BlockSpec(memory_space=pltpu.MemorySpace.VMEM),
    )(x_bcs, wc_row, shift, w12_row, b12)


# --------------------------------------------------------------------------
# Parameter setup (deterministic, synthetic) + one-time weight folding
# --------------------------------------------------------------------------
def init_params(key, res_filters=256, filters=1, board_size=13, fc_hidden=256):
    ks = jax.random.split(key, 8)
    fc_in = filters * board_size * board_size
    return {
        # Conv2d(res_filters, filters, kernel_size=1): weight (F, Cin, 1, 1)
        "conv_w": 0.05 * jax.random.normal(ks[0], (filters, res_filters, 1, 1), jnp.float32),
        "conv_b": 0.05 * jax.random.normal(ks[1], (filters,), jnp.float32),
        # BatchNorm2d(filters)
        "bn_gamma": 1.0 + 0.1 * jax.random.normal(ks[2], (filters,), jnp.float32),
        "bn_beta": 0.1 * jax.random.normal(ks[3], (filters,), jnp.float32),
        "bn_mean": 0.1 * jax.random.normal(ks[4], (filters,), jnp.float32),
        "bn_var": 0.5 + jax.random.uniform(ks[5], (filters,), jnp.float32),
        # Linear(fc_in, 256): weight (256, fc_in)
        "fc1_w": 0.05 * jax.random.normal(ks[6], (fc_hidden, fc_in), jnp.float32),
        "fc1_b": jnp.zeros((fc_hidden,), jnp.float32),
        # Linear(256, 1): weight (1, 256)
        "fc2_w": 0.05 * jax.random.normal(ks[7], (1, fc_hidden), jnp.float32),
        "fc2_b": jnp.zeros((1,), jnp.float32),
    }


def prepare_params(params, eps=1e-5):
    """One-time folding outside the per-call path:
       * conv bias + BatchNorm (eval mode) into the 1x1 conv weight,
       * fc2 . fc1 into a single affine map (no activation between them in the
         reference forward)."""
    # TODO(synk): BatchNorm folded in eval (running-stats) mode; PyTorch
    # training-mode batch statistics are not reproduced.
    hp = jax.lax.Precision.HIGHEST
    F_out, C = params["conv_w"].shape[:2]
    inv_std = 1.0 / jnp.sqrt(params["bn_var"] + eps)                 # (F,)
    scale = params["bn_gamma"] * inv_std                             # (F,); F == 1
    wc_row = params["conv_w"].reshape(F_out, C) * scale[:, None]     # (1, C)
    shift = params["bn_beta"] + (params["conv_b"] - params["bn_mean"]) * scale  # (1,)
    # fc2(fc1(f)) = f @ (fc1_w.T @ fc2_w.T) + (fc1_b @ fc2_w.T + fc2_b)
    w12_row = jnp.dot(params["fc2_w"], params["fc1_w"], precision=hp)            # (1, fc_in)
    b12 = jnp.dot(params["fc2_w"], params["fc1_b"], precision=hp) + params["fc2_b"]  # (1,)
    return {
        "wc_row": wc_row.astype(jnp.float32),                        # (1, C)
        "shift": shift.reshape(1).astype(jnp.float32),               # (1,)
        "w12_row": w12_row.astype(jnp.float32),                      # (1, fc_in)
        "b12": b12.reshape(1).astype(jnp.float32),                   # (1,)
    }


@jax.jit
def value_head_forward(x, prepped):
    """x: (B, Cin, H, W) float32, NCHW like PyTorch. Returns (B, 1)."""
    B, C, H, W = x.shape
    x_bcs = x.reshape(B, C, H * W)   # free reshape of contiguous NCHW; no transpose
    return value_head_pallas(x_bcs, prepped["wc_row"], prepped["shift"],
                             prepped["w12_row"], prepped["b12"])


# --------------------------------------------------------------------------
# Pure-JAX reference (eval-mode BN, unfolded fc1/fc2) for correctness checking
# --------------------------------------------------------------------------
def value_head_reference(x, params, eps=1e-5):
    B, C, H, W = x.shape
    F_out = params["conv_w"].shape[0]
    w = params["conv_w"].reshape(F_out, C)
    hp = jax.lax.Precision.HIGHEST
    y = jnp.einsum("bchw,fc->bfhw", x, w, precision=hp)
    y = y + params["conv_b"][None, :, None, None]
    inv_std = 1.0 / jnp.sqrt(params["bn_var"] + eps)
    y = ((y - params["bn_mean"][None, :, None, None])
         * (params["bn_gamma"] * inv_std)[None, :, None, None]
         + params["bn_beta"][None, :, None, None])
    y = jnp.maximum(y, 0.0)
    feat = y.reshape(B, -1)
    h = jnp.dot(feat, params["fc1_w"].T, precision=hp) + params["fc1_b"]
    v = jnp.dot(h, params["fc2_w"].T, precision=hp) + params["fc2_b"]
    return jnp.tanh(v)


if __name__ == "__main__":
    key = jax.random.PRNGKey(0)
    k_x, k_p = jax.random.split(key)

    B, C, board = 2, 256, 13
    x = jax.random.normal(k_x, (B, C, board, board), jnp.float32)
    params = init_params(k_p, res_filters=C, filters=1, board_size=board)
    prepped = prepare_params(params)

    out = value_head_forward(x, prepped)
    out = jax.block_until_ready(out)

    assert out.shape == (B, 1)
    assert bool(jnp.all(jnp.abs(out) <= 1.0))          # tanh output range

    ref = value_head_reference(x, params)
    assert bool(jnp.allclose(out, ref, atol=2e-3, rtol=2e-3)), (out, ref)

    print("KERNEL_OK")
</pallas_src>

<mosaic_0001>
module attributes {stable_mosaic.version = 11 : i64} {
  func.func @_value_head_kernel(%arg0: memref<2x256x169xf32, #tpu.memory_space<vmem>>, %arg1: memref<1x256xf32, #tpu.memory_space<vmem>>, %arg2: memref<1xf32, #tpu.memory_space<smem>>, %arg3: memref<1x169xf32, #tpu.memory_space<vmem>>, %arg4: memref<1xf32, #tpu.memory_space<smem>>, %arg5: memref<2x1xf32, #tpu.memory_space<vmem>>) attributes {dimension_semantics = [], scalar_prefetch = 0 : i64, scratch_operands = 0 : i64, tpu.core_type = #tpu.core_type<tc>} {
    %c0 = arith.constant 0 : index
    %c0_0 = arith.constant 0 : index
    %0 = vector.load %arg1[%c0, %c0_0] : memref<1x256xf32, #tpu.memory_space<vmem>>, vector<1x256xf32>
    %c0_1 = arith.constant 0 : index
    %c0_2 = arith.constant 0 : index
    %1 = vector.load %arg3[%c0_1, %c0_2] : memref<1x169xf32, #tpu.memory_space<vmem>>, vector<1x169xf32>
    %c0_3 = arith.constant 0 : index
    %2 = memref.load %arg2[%c0_3] : memref<1xf32, #tpu.memory_space<smem>>
    %c0_4 = arith.constant 0 : index
    %3 = memref.load %arg4[%c0_4] : memref<1xf32, #tpu.memory_space<smem>>
    %c0_5 = arith.constant 0 : index
    %c0_6 = arith.constant 0 : index
    %c0_7 = arith.constant 0 : index
    %4 = vector.load %arg0[%c0_5, %c0_6, %c0_7] : memref<2x256x169xf32, #tpu.memory_space<vmem>>, vector<1x256x169xf32>
    %5 = vector.shape_cast %4 : vector<1x256x169xf32> to vector<256x169xf32>
    %cst = arith.constant dense<0.000000e+00> : vector<1x169xf32>
    %6 = tpu.matmul %0, %5, %cst {dimension_numbers = #tpu.dot_dimension_numbers<[1], [0], [0], [1], [0, 0, 1, 1], [], []>} : vector<1x256xf32>, vector<256x169xf32>, vector<1x169xf32> -> vector<1x169xf32>
    %7 = vector.broadcast %2 : f32 to vector<1x169xf32>
    %8 = arith.addf %6, %7 : vector<1x169xf32>
    %cst_8 = arith.constant 0.000000e+00 : f32
    %9 = vector.broadcast %cst_8 : f32 to vector<1x169xf32>
    %10 = arith.maximumf %8, %9 : vector<1x169xf32>
    %11 = arith.mulf %10, %1 : vector<1x169xf32>
    %cst_9 = arith.constant dense<0.000000e+00> : vector<1xf32>
    %12 = vector.multi_reduction <add>, %11, %cst_9 [1] : vector<1x169xf32> to vector<1xf32>
    %13 = vector.shape_cast %12 : vector<1xf32> to vector<1x1xf32>
    %14 = vector.broadcast %3 : f32 to vector<1x1xf32>
    %15 = arith.addf %13, %14 : vector<1x1xf32>
    %16 = math.tanh %15 : vector<1x1xf32>
    %c0_10 = arith.constant 0 : index
    %c0_11 = arith.constant 0 : index
    %17 = vector.load %arg5[%c0_10, %c0_11] : memref<2x1xf32, #tpu.memory_space<vmem>>, vector<1x1xf32>
    tpu.vector_store %arg5[%c0_10, %c0_11], %16 {strides = array<i32>} : memref<2x1xf32, #tpu.memory_space<vmem>>, vector<1x1xf32>,
    %c1 = arith.constant 1 : index
    %c0_12 = arith.constant 0 : index
    %c0_13 = arith.constant 0 : index
    %18 = vector.load %arg0[%c1, %c0_12, %c0_13] : memref<2x256x169xf32, #tpu.memory_space<vmem>>, vector<1x256x169xf32>
    %19 = vector.shape_cast %18 : vector<1x256x169xf32> to vector<256x169xf32>
    %cst_14 = arith.constant dense<0.000000e+00> : vector<1x169xf32>
    %20 = tpu.matmul %0, %19, %cst_14 {dimension_numbers = #tpu.dot_dimension_numbers<[1], [0], [0], [1], [0, 0, 1, 1], [], []>} : vector<1x256xf32>, vector<256x169xf32>, vector<1x169xf32> -> vector<1x169xf32>
    %21 = vector.broadcast %2 : f32 to vector<1x169xf32>
    %22 = arith.addf %20, %21 : vector<1x169xf32>
    %cst_15 = arith.constant 0.000000e+00 : f32
    %23 = vector.broadcast %cst_15 : f32 to vector<1x169xf32>
    %24 = arith.maximumf %22, %23 : vector<1x169xf32>
    %25 = arith.mulf %24, %1 : vector<1x169xf32>
    %cst_16 = arith.constant dense<0.000000e+00> : vector<1xf32>
    %26 = vector.multi_reduction <add>, %25, %cst_16 [1] : vector<1x169xf32> to vector<1xf32>
    %27 = vector.shape_cast %26 : vector<1xf32> to vector<1x1xf32>
    %28 = vector.broadcast %3 : f32 to vector<1x1xf32>
    %29 = arith.addf %27, %28 : vector<1x1xf32>
    %30 = math.tanh %29 : vector<1x1xf32>
    %c1_17 = arith.constant 1 : index
    %c0_18 = arith.constant 0 : index
    %31 = vector.load %arg5[%c1_17, %c0_18] : memref<2x1xf32, #tpu.memory_space<vmem>>, vector<1x1xf32>
    tpu.vector_store %arg5[%c1_17, %c0_18], %30 {strides = array<i32>} : memref<2x1xf32, #tpu.memory_space<vmem>>, vector<1x1xf32>,
    return
  }
}

</mosaic_0001>

<bundles_post_ra>
// kernel: value_head_forward.1
= control target key start
LH: loop header
LB: loop body
LE: loop exit
PB: predicated region body
PF: predicated region fallthrough
CT: control target
= control target key end

     0   :  { %vm188_vm0 = vcmask 1040384   ;;  %vm190_vm1 = vcmask 327680   ;;  %vm198_vm2 = vcmask 0   ;;  %s992_s0 = inlined_call_operand.vmem [shape: f32[2,256,169], index: 0, kind: input, shape index: {}]   ;;  %s993_s1 = inlined_call_operand.vmem [shape: f32[1,256], index: 1, kind: input, shape index: {}]   ;;  %s994_s2 = inlined_call_operand.<no memory space> [shape: f32[1], index: 2, kind: input, shape index: {}]   ;;  %s995_s3 = inlined_call_operand.vmem [shape: f32[1,169], index: 3, kind: input, shape index: {}]   ;;  %s996_s4 = inlined_call_operand.<no memory space> [shape: f32[1], index: 4, kind: input, shape index: {}]   ;;  %s997_s5 = inlined_call_operand.vmem [shape: f32[2,1], index: 5, kind: output, shape index: {}]  }
   0x1   :  { %v27_v0 = vld [vmem:[%s992_s0 + $0x8] sm:$0xff]  ;;  %v29_v1 = vld [vmem:[%s992_s0 + $0x18] sm:$0xff]  ;;  %v26_v2 = vld [vmem:[%s992_s0] sm:$0xff] }
   0x2   :  { %v416_v3 = vpack.c.bf16 %v29_v1, %v27_v0  ;;  %v28_v4 = vld [vmem:[%s992_s0 + $0x10] sm:$0xff]  ;;  %v353_v5 = vld [vmem:[%s992_s0 + $0x208] sm:$0xff]  ;;  %v355_v6 = vld [vmem:[%s992_s0 + $0x218] sm:$0xff] }
   0x3   :  { %v418_v7 = vpack.c.bf16 %v28_v4, %v26_v2  ;;  %v480_v8 = vpack.c.bf16 %v355_v6, %v353_v5  ;;  %v31_v9 = vld [vmem:[%s992_s0 + $0x28] sm:$0xff]  ;;  %v33_v10 = vld [vmem:[%s992_s0 + $0x38] sm:$0xff]  ;;  %v352_v11 = vld [vmem:[%s992_s0 + $0x200] sm:$0xff] }
   0x4   :  { %417 = vmatprep.subr.bf16.mxu0 %v416_v3  ;;  %v420_v12 = vpack.c.bf16 %v33_v10, %v31_v9  ;;  %v354_v13 = vld [vmem:[%s992_s0 + $0x210] sm:$0xff]  ;;  %v30_v14 = vld [vmem:[%s992_s0 + $0x20] sm:$0xff]  ;;  %v357_v18 = vld [vmem:[%s992_s0 + $0x228] sm:$0xff] }
   0x5   :  { %v32_v15 = vld [vmem:[%s992_s0 + $0x30] sm:$0xff]  ;;  %419 = vmatpush1.bf16.msra.mxu0 %v418_v7  ;;  %481 = vmatprep.subr.bf16.mxu1 %v480_v8  ;;  %v482_v16 = vpack.c.bf16 %v354_v13, %v352_v11  ;;  %v359_v19 = vld [vmem:[%s992_s0 + $0x238] sm:$0xff]  ;;  %v35_v20 = vld [vmem:[%s992_s0 + $0x48] sm:$0xff] }
   0x6   :  { %v422_v17 = vpack.c.bf16 %v32_v15, %v30_v14  ;;  %421 = vmatprep.subr.bf16.mxu0 %v420_v12  ;;  %v484_v21 = vpack.c.bf16 %v359_v19, %v357_v18  ;;  %v37_v22 = vld [vmem:[%s992_s0 + $0x58] sm:$0xff]  ;;  %v356_v23 = vld [vmem:[%s992_s0 + $0x220] sm:$0xff]  ;;  %v358_v24 = vld [vmem:[%s992_s0 + $0x230] sm:$0xff] }
   0x7   :  { %483 = vmatpush1.bf16.msra.mxu1 %v482_v16  ;;  %v424_v25 = vpack.c.bf16 %v37_v22, %v35_v20  ;;  %v486_v26 = vpack.c.bf16 %v358_v24, %v356_v23  ;;  %v34_v27 = vld [vmem:[%s992_s0 + $0x40] sm:$0xff]  ;;  %v36_v28 = vld [vmem:[%s992_s0 + $0x50] sm:$0xff]  ;;  %v361_v29 = vld [vmem:[%s992_s0 + $0x248] sm:$0xff] }
   0x8   :  { %485 = vmatprep.subr.bf16.mxu1 %v484_v21  ;;  %v363_v30 = vld [vmem:[%s992_s0 + $0x258] sm:$0xff]  ;;  %v39_v31 = vld [vmem:[%s992_s0 + $0x68] sm:$0xff]  ;;  %v426_v33 = vpack.c.bf16 %v36_v28, %v34_v27  ;;  %v360_v35 = vld [vmem:[%s992_s0 + $0x240] sm:$0xff] }
   0x9   :  { %v41_v32 = vld [vmem:[%s992_s0 + $0x78] sm:$0xff]  ;;  %423 = vmatpush1.bf16.msra.mxu0 %v422_v17  ;;  %v488_v34 = vpack.c.bf16 %v363_v30, %v361_v29  ;;  %v362_v36 = vld [vmem:[%s992_s0 + $0x250] sm:$0xff]  ;;  %v38_v37 = vld [vmem:[%s992_s0 + $0x60] sm:$0xff] }
   0xa   :  { %425 = vmatprep.subr.bf16.mxu0 %v424_v25  ;;  %v428_v38 = vpack.c.bf16 %v41_v32, %v39_v31  ;;  %v40_v39 = vld [vmem:[%s992_s0 + $0x70] sm:$0xff]  ;;  %v365_v40 = vld [vmem:[%s992_s0 + $0x268] sm:$0xff]  ;;  %v367_v41 = vld [vmem:[%s992_s0 + $0x278] sm:$0xff]  ;;  %v490_v42 = vpack.c.bf16 %v362_v36, %v360_v35 }
   0xb   :  { %487 = vmatpush1.bf16.msra.mxu1 %v486_v26  ;;  %v43_v43 = vld [vmem:[%s992_s0 + $0x88] sm:$0xff]  ;;  %v45_v44 = vld [vmem:[%s992_s0 + $0x98] sm:$0xff]  ;;  %v492_v45 = vpack.c.bf16 %v367_v41, %v365_v40  ;;  %v364_v46 = vld [vmem:[%s992_s0 + $0x260] sm:$0xff]  ;;  %v430_v48 = vpack.c.bf16 %v40_v39, %v38_v37  ;;  %v92_v41 = vlaneseq }
   0xc   :  { %489 = vmatprep.subr.bf16.mxu1 %v488_v34  ;;  %v366_v47 = vld [vmem:[%s992_s0 + $0x270] sm:$0xff]  ;;  %v369_v49 = vld [vmem:[%s992_s0 + $0x288] sm:$0xff]  ;;  %v371_v50 = vld [vmem:[%s992_s0 + $0x298] sm:$0xff]  ;;  %v432_v51 = vpack.c.bf16 %v45_v44, %v43_v43 }
   0xd   :  { %427 = vmatpush1.bf16.msra.mxu0 %v426_v33  ;;  %v42_v52 = vld [vmem:[%s992_s0 + $0x80] sm:$0xff]  ;;  %v44_v53 = vld [vmem:[%s992_s0 + $0x90] sm:$0xff]  ;;  %v494_v54 = vpack.c.bf16 %v366_v47, %v364_v46  ;;  %v47_v55 = vld [vmem:[%s992_s0 + $0xa8] sm:$0xff]  ;;  %v496_v57 = vpack.c.bf16 %v371_v50, %v369_v49 }
   0xe   :  { %429 = vmatprep.subr.bf16.mxu0 %v428_v38  ;;  %v49_v56 = vld [vmem:[%s992_s0 + $0xb8] sm:$0xff]  ;;  %v368_v58 = vld [vmem:[%s992_s0 + $0x280] sm:$0xff]  ;;  %v370_v59 = vld [vmem:[%s992_s0 + $0x290] sm:$0xff]  ;;  %v434_v60 = vpack.c.bf16 %v44_v53, %v42_v52 }
   0xf   :  { %491 = vmatpush1.bf16.msra.mxu1 %v490_v42  ;;  %v373_v61 = vld [vmem:[%s992_s0 + $0x2a8] sm:$0xff]  ;;  %v375_v62 = vld [vmem:[%s992_s0 + $0x2b8] sm:$0xff]  ;;  %v436_v63 = vpack.c.bf16 %v49_v56, %v47_v55  ;;  %v46_v0 = vld [vmem:[%s992_s0 + $0xa0] sm:$0xff]  ;;  %v498_v2 = vpack.c.bf16 %v370_v59, %v368_v58 }
  0x10   :  { %493 = vmatprep.subr.bf16.mxu1 %v492_v45  ;;  %v48_v1 = vld [vmem:[%s992_s0 + $0xb0] sm:$0xff]  ;;  %v51_v3 = vld [vmem:[%s992_s0 + $0xc8] sm:$0xff]  ;;  %v53_v4 = vld [vmem:[%s992_s0 + $0xd8] sm:$0xff]  ;;  %v500_v5 = vpack.c.bf16 %v375_v62, %v373_v61 }
  0x11   :  { %431 = vmatpush1.bf16.msra.mxu0 %v430_v48  ;;  %v372_v6 = vld [vmem:[%s992_s0 + $0x2a0] sm:$0xff]  ;;  %v374_v7 = vld [vmem:[%s992_s0 + $0x2b0] sm:$0xff]  ;;  %v438_v8 = vpack.c.bf16 %v48_v1, %v46_v0  ;;  %v377_v9 = vld [vmem:[%s992_s0 + $0x2c8] sm:$0xff]  ;;  %v440_v11 = vpack.c.bf16 %v53_v4, %v51_v3 }
  0x12   :  { %433 = vmatprep.subr.bf16.mxu0 %v432_v51  ;;  %v379_v10 = vld [vmem:[%s992_s0 + $0x2d8] sm:$0xff]  ;;  %v50_v12 = vld [vmem:[%s992_s0 + $0xc0] sm:$0xff]  ;;  %v52_v13 = vld [vmem:[%s992_s0 + $0xd0] sm:$0xff]  ;;  %v502_v14 = vpack.c.bf16 %v374_v7, %v372_v6 }
  0x13   :  { %495 = vmatpush1.bf16.msra.mxu1 %v494_v54  ;;  %v55_v15 = vld [vmem:[%s992_s0 + $0xe8] sm:$0xff]  ;;  %v57_v16 = vld [vmem:[%s992_s0 + $0xf8] sm:$0xff]  ;;  %v504_v17 = vpack.c.bf16 %v379_v10, %v377_v9  ;;  %v376_v18 = vld [vmem:[%s992_s0 + $0x2c0] sm:$0xff]  ;;  %v442_v20 = vpack.c.bf16 %v52_v13, %v50_v12  ;;  %v818_v54 = vshrl.u32 %v92_v41, 7 }
  0x14   :  { %497 = vmatprep.subr.bf16.mxu1 %v496_v57  ;;  %v378_v19 = vld [vmem:[%s992_s0 + $0x2d0] sm:$0xff]  ;;  %v381_v21 = vld [vmem:[%s992_s0 + $0x2e8] sm:$0xff]  ;;  %v383_v22 = vld [vmem:[%s992_s0 + $0x2f8] sm:$0xff]  ;;  %v444_v23 = vpack.c.bf16 %v57_v16, %v55_v15 }
  0x15   :  { %435 = vmatpush1.bf16.msra.mxu0 %v434_v60  ;;  %v54_v24 = vld [vmem:[%s992_s0 + $0xe0] sm:$0xff]  ;;  %v56_v25 = vld [vmem:[%s992_s0 + $0xf0] sm:$0xff]  ;;  %v506_v26 = vpack.c.bf16 %v378_v19, %v376_v18  ;;  %v59_v27 = vld [vmem:[%s992_s0 + $0x108] sm:$0xff]  ;;  %v508_v29 = vpack.c.bf16 %v383_v22, %v381_v21  ;;  %v98_v3 = vsub.s32 1, %v818_v54 }
  0x16   :  { %437 = vmatprep.subr.bf16.mxu0 %v436_v63  ;;  %v61_v28 = vld [vmem:[%s992_s0 + $0x118] sm:$0xff]  ;;  %v380_v30 = vld [vmem:[%s992_s0 + $0x2e0] sm:$0xff]  ;;  %v382_v31 = vld [vmem:[%s992_s0 + $0x2f0] sm:$0xff]  ;;  %v446_v32 = vpack.c.bf16 %v56_v25, %v54_v24 }
  0x17   :  { %499 = vmatpush1.bf16.msra.mxu1 %v498_v2  ;;  %v385_v33 = vld [vmem:[%s992_s0 + $0x308] sm:$0xff]  ;;  %v387_v34 = vld [vmem:[%s992_s0 + $0x318] sm:$0xff]  ;;  %v448_v35 = vpack.c.bf16 %v61_v28, %v59_v27  ;;  %v58_v36 = vld [vmem:[%s992_s0 + $0x100] sm:$0xff]  ;;  %v510_v38 = vpack.c.bf16 %v382_v31, %v380_v30 }
  0x18   :  { %501 = vmatprep.subr.bf16.mxu1 %v500_v5  ;;  %v60_v37 = vld [vmem:[%s992_s0 + $0x110] sm:$0xff]  ;;  %v63_v39 = vld [vmem:[%s992_s0 + $0x128] sm:$0xff]  ;;  %v65_v40 = vld [vmem:[%s992_s0 + $0x138] sm:$0xff]  ;;  %v512_v42 = vpack.c.bf16 %v387_v34, %v385_v33 }
  0x19   :  { %439 = vmatpush1.bf16.msra.mxu0 %v438_v8  ;;  %v384_v43 = vld [vmem:[%s992_s0 + $0x300] sm:$0xff]  ;;  %v386_v44 = vld [vmem:[%s992_s0 + $0x310] sm:$0xff]  ;;  %v450_v45 = vpack.c.bf16 %v60_v37, %v58_v36  ;;  %v389_v46 = vld [vmem:[%s992_s0 + $0x328] sm:$0xff]  ;;  %v452_v48 = vpack.c.bf16 %v65_v40, %v63_v39 }
  0x1a   :  { %441 = vmatprep.subr.bf16.mxu0 %v440_v11  ;;  %v391_v47 = vld [vmem:[%s992_s0 + $0x338] sm:$0xff]  ;;  %v62_v49 = vld [vmem:[%s992_s0 + $0x120] sm:$0xff]  ;;  %v64_v50 = vld [vmem:[%s992_s0 + $0x130] sm:$0xff]  ;;  %v514_v51 = vpack.c.bf16 %v386_v44, %v384_v43 }
  0x1b   :  { %503 = vmatpush1.bf16.msra.mxu1 %v502_v14  ;;  %v67_v52 = vld [vmem:[%s992_s0 + $0x148] sm:$0xff]  ;;  %v69_v53 = vld [vmem:[%s992_s0 + $0x158] sm:$0xff]  ;;  %v516_v55 = vpack.c.bf16 %v391_v47, %v389_v46  ;;  %v388_v56 = vld [vmem:[%s992_s0 + $0x320] sm:$0xff]  ;;  %v454_v58 = vpack.c.bf16 %v64_v50, %v62_v49 }
  0x1c   :  { %505 = vmatprep.subr.bf16.mxu1 %v504_v17  ;;  %v390_v57 = vld [vmem:[%s992_s0 + $0x330] sm:$0xff]  ;;  %v393_v59 = vld [vmem:[%s992_s0 + $0x348] sm:$0xff]  ;;  %v395_v60 = vld [vmem:[%s992_s0 + $0x358] sm:$0xff]  ;;  %v456_v61 = vpack.c.bf16 %v69_v53, %v67_v52 }
  0x1d   :  { %443 = vmatpush1.bf16.msra.mxu0 %v442_v20  ;;  %v66_v62 = vld [vmem:[%s992_s0 + $0x140] sm:$0xff]  ;;  %v68_v63 = vld [vmem:[%s992_s0 + $0x150] sm:$0xff]  ;;  %v518_v0 = vpack.c.bf16 %v390_v57, %v388_v56  ;;  %v71_v1 = vld [vmem:[%s992_s0 + $0x168] sm:$0xff]  ;;  %v520_v4 = vpack.c.bf16 %v395_v60, %v393_v59 }
  0x1e   :  { %445 = vmatprep.subr.bf16.mxu0 %v444_v23  ;;  %v73_v2 = vld [vmem:[%s992_s0 + $0x178] sm:$0xff]  ;;  %v392_v5 = vld [vmem:[%s992_s0 + $0x340] sm:$0xff]  ;;  %v394_v6 = vld [vmem:[%s992_s0 + $0x350] sm:$0xff]  ;;  %v458_v7 = vpack.c.bf16 %v68_v63, %v66_v62 }
  0x1f   :  { %507 = vmatpush1.bf16.msra.mxu1 %v506_v26  ;;  %v397_v8 = vld [vmem:[%s992_s0 + $0x368] sm:$0xff]  ;;  %v399_v9 = vld [vmem:[%s992_s0 + $0x378] sm:$0xff]  ;;  %v460_v10 = vpack.c.bf16 %v73_v2, %v71_v1  ;;  %v70_v11 = vld [vmem:[%s992_s0 + $0x160] sm:$0xff]  ;;  %v522_v14 = vpack.c.bf16 %v394_v6, %v392_v5  ;;  %v94_v1 = vsub.s32 0, %v818_v54 }
  0x20   :  { %509 = vmatprep.subr.bf16.mxu1 %v508_v29  ;;  %v72_v12 = vld [vmem:[%s992_s0 + $0x170] sm:$0xff]  ;;  %v866_v13 = vld [vmem:[%s993_s1] sm:$0x3]  ;;  %v75_v15 = vld [vmem:[%s992_s0 + $0x188] sm:$0xff]  ;;  %v524_v18 = vpack.c.bf16 %v399_v9, %v397_v8  ;;  %v90_v9 = vstv %s994_s2 }
  0x21   :  { %447 = vmatpush1.bf16.msra.mxu0 %v446_v32  ;;  %v77_v16 = vld [vmem:[%s992_s0 + $0x198] sm:$0xff]  ;;  %v99_v17 = vrot.slane %v866_v13, %v98_v3  ;;  %v396_v19 = vld [vmem:[%s992_s0 + $0x360] sm:$0xff]  ;;  %v398_v20 = vld [vmem:[%s992_s0 + $0x370] sm:$0xff]  ;;  %v462_v21 = vpack.c.bf16 %v72_v12, %v70_v11  ;;  %v95_v8 = vrot.slane %v866_v13, %v94_v1 }
  0x22   :  { %449 = vmatprep.subr.bf16.mxu0 %v448_v35  ;;  %v401_v22 = vld [vmem:[%s992_s0 + $0x388] sm:$0xff]  ;;  %v403_v23 = vld [vmem:[%s992_s0 + $0x398] sm:$0xff]  ;;  %v464_v24 = vpack.c.bf16 %v77_v16, %v75_v15  ;;  %v74_v25 = vld [vmem:[%s992_s0 + $0x180] sm:$0xff]  ;;  %v526_v27 = vpack.c.bf16 %v398_v20, %v396_v19 }
  0x23   :  { %511 = vmatpush1.bf16.msra.mxu1 %v510_v38  ;;  %166 = vmatprep.mubr.f32.mxu0 %v99_v17  ;;  %v76_v26 = vld [vmem:[%s992_s0 + $0x190] sm:$0xff]  ;;  %v79_v28 = vld [vmem:[%s992_s0 + $0x1a8] sm:$0xff]  ;;  %v81_v29 = vld [vmem:[%s992_s0 + $0x1b8] sm:$0xff]  ;;  %v528_v30 = vpack.c.bf16 %v403_v23, %v401_v22 }
  0x24   :  { %513 = vmatprep.subr.bf16.mxu1 %v512_v42  ;;  %329 = vmatprep.mubr.f32.mxu1 %v99_v17  ;;  %v400_v31 = vld [vmem:[%s992_s0 + $0x380] sm:$0xff]  ;;  %v402_v32 = vld [vmem:[%s992_s0 + $0x390] sm:$0xff]  ;;  %v466_v33 = vpack.c.bf16 %v76_v26, %v74_v25  ;;  %v405_v34 = vld [vmem:[%s992_s0 + $0x3a8] sm:$0xff]  ;;  %v468_v36 = vpack.c.bf16 %v81_v29, %v79_v28 }
  0x25   :  { %451 = vmatpush1.bf16.msra.mxu0 %v450_v45  ;;  %v407_v35 = vld [vmem:[%s992_s0 + $0x3b8] sm:$0xff]  ;;  %v78_v37 = vld [vmem:[%s992_s0 + $0x1a0] sm:$0xff]  ;;  %v80_v38 = vld [vmem:[%s992_s0 + $0x1b0] sm:$0xff]  ;;  %v530_v39 = vpack.c.bf16 %v402_v32, %v400_v31 }
  0x26   :  { %453 = vmatprep.subr.bf16.mxu0 %v452_v48  ;;  %v83_v40 = vld [vmem:[%s992_s0 + $0x1c8] sm:$0xff]  ;;  %v85_v41 = vld [vmem:[%s992_s0 + $0x1d8] sm:$0xff]  ;;  %v532_v42 = vpack.c.bf16 %v407_v35, %v405_v34  ;;  %v404_v43 = vld [vmem:[%s992_s0 + $0x3a0] sm:$0xff]  ;;  %v470_v45 = vpack.c.bf16 %v80_v38, %v78_v37 }
  0x27   :  { %515 = vmatpush1.bf16.msra.mxu1 %v514_v51  ;;  %v406_v44 = vld [vmem:[%s992_s0 + $0x3b0] sm:$0xff]  ;;  %v409_v46 = vld [vmem:[%s992_s0 + $0x3c8] sm:$0xff]  ;;  %v411_v47 = vld [vmem:[%s992_s0 + $0x3d8] sm:$0xff]  ;;  %v472_v48 = vpack.c.bf16 %v85_v41, %v83_v40 }
  0x28   :  { %517 = vmatprep.subr.bf16.mxu1 %v516_v55  ;;  %v82_v49 = vld [vmem:[%s992_s0 + $0x1c0] sm:$0xff]  ;;  %v84_v50 = vld [vmem:[%s992_s0 + $0x1d0] sm:$0xff]  ;;  %v534_v51 = vpack.c.bf16 %v406_v44, %v404_v43  ;;  %v87_v52 = vld [vmem:[%s992_s0 + $0x1e8] sm:$0xff]  ;;  %v536_v55 = vpack.c.bf16 %v411_v47, %v409_v46 }
  0x29   :  { %455 = vmatpush1.bf16.msra.mxu0 %v454_v58  ;;  %v89_v53 = vld [vmem:[%s992_s0 + $0x1f8] sm:$0xff]  ;;  %v408_v56 = vld [vmem:[%s992_s0 + $0x3c0] sm:$0xff]  ;;  %v410_v57 = vld [vmem:[%s992_s0 + $0x3d0] sm:$0xff]  ;;  %v474_v58 = vpack.c.bf16 %v84_v50, %v82_v49 }
  0x2a   :  { %457 = vmatprep.subr.bf16.mxu0 %v456_v61  ;;  %v413_v59 = vld [vmem:[%s992_s0 + $0x3e8] sm:$0xff]  ;;  %v415_v60 = vld [vmem:[%s992_s0 + $0x3f8] sm:$0xff]  ;;  %v476_v61 = vpack.c.bf16 %v89_v53, %v87_v52  ;;  %v86_v62 = vld [vmem:[%s992_s0 + $0x1e0] sm:$0xff] }
  0x2b   :  { %519 = vmatpush1.bf16.msra.mxu1 %v518_v0  ;;  %v88_v63 = vld [vmem:[%s992_s0 + $0x1f0] sm:$0xff]  ;;  %v538_v0 = vpack.c.bf16 %v410_v57, %v408_v56  ;;  %v540_v2 = vpack.c.bf16 %v415_v60, %v413_v59 }
  0x2c   :  { %521 = vmatprep.subr.bf16.mxu1 %v520_v4  ;;  %v412_v4 = vld [vmem:[%s992_s0 + $0x3e0] sm:$0xff]  ;;  %v414_v5 = vld [vmem:[%s992_s0 + $0x3f0] sm:$0xff]  ;;  %v478_v6 = vpack.c.bf16 %v88_v63, %v86_v62 }
  0x2d   :  { %459 = vmatpush1.bf16.msra.mxu0 %v458_v7  ;;  %v542_v7 = vpack.c.bf16 %v414_v5, %v412_v4 }
  0x2e   :  { %461 = vmatprep.subr.bf16.mxu0 %v460_v10  ;;  %v23_v10 = vld [vmem:[%s995_s3] sm:$0x3] }
  0x2f   :  { %523 = vmatpush1.bf16.msra.mxu1 %v522_v14  ;;  %v179_v15 = vrot.slane %v23_v10, %v94_v1  ;;  %v183_v13 = vrot.slane %v23_v10, %v98_v3  ;;  %v195_v3 = vstv %s996_s4 }
  0x30   :  { %525 = vmatprep.subr.bf16.mxu1 %v524_v18 }
  0x31   :  { %463 = vmatpush1.bf16.msra.mxu0 %v462_v21 }
  0x32   :  { %465 = vmatprep.subr.bf16.mxu0 %v464_v24 }
  0x33   :  { %527 = vmatpush1.bf16.msra.mxu1 %v526_v27 }
  0x34   :  { %529 = vmatprep.subr.bf16.mxu1 %v528_v30 }
  0x35   :  { %467 = vmatpush1.bf16.msra.mxu0 %v466_v33 }
  0x36   :  { %469 = vmatprep.subr.bf16.mxu0 %v468_v36 }
  0x37   :  { %531 = vmatpush1.bf16.msra.mxu1 %v530_v39 }
  0x38   :  { %533 = vmatprep.subr.bf16.mxu1 %v532_v42 }
  0x39   :  { %471 = vmatpush1.bf16.msra.mxu0 %v470_v45 }
  0x3a   :  { %473 = vmatprep.subr.bf16.mxu0 %v472_v48 }
  0x3b   :  { %535 = vmatpush1.bf16.msra.mxu1 %v534_v51 }
  0x3c   :  { %537 = vmatprep.subr.bf16.mxu1 %v536_v55 }
  0x3d   :  { %475 = vmatpush1.bf16.msra.mxu0 %v474_v58 }
  0x3e   :  { %477 = vmatprep.subr.bf16.mxu0 %v476_v61 }
  0x3f   :  { %539 = vmatpush1.bf16.msra.mxu1 %v538_v0 }
  0x40   :  { %541 = vmatprep.subr.bf16.mxu1 %v540_v2 }
  0x41   :  { %479 = vmatpush1.bf16.msra.mxu0 %v478_v6 }
  0x43   :  { %543 = vmatpush1.bf16.msra.mxu1 %v542_v7 }
  0x44   :  { %167 = vmatmul.mubr.f32.vlgmr.msra.gmra.mrb[0].mxu0 %v95_v8 }
  0x46   :  { %330 = vmatmul.mubr.f32.vlgmr.msra.gmra.mrb[0].mxu1 %v95_v8 }
 0x117   :  { %v168_v11 = vpop.f32.mrb[0].mxu0 }
 0x118   :  { %v169_v12 = vadd.f32 %v168_v11, %v90_v9  ;;  %v170_v14 = vpop.f32.mrb[1].mxu0 }
 0x119   :  { %v171_v16 = vadd.f32 %v170_v14, %v90_v9  ;;  %v331_v17 = vpop.f32.mrb[0].mxu1 }
 0x11a   :  { %v173_v18 = vmax.f32 %v169_v12, 0.0  ;;  %v332_v19 = vadd.f32 %v331_v17, %v90_v9  ;;  %v333_v20 = vpop.f32.mrb[1].mxu1 }
 0x11b   :  { %v174_v21 = vmax.f32 %v171_v16, 0.0  ;;  %v334_v22 = vadd.f32 %v333_v20, %v90_v9 }
 0x11c   :  { %v336_v23 = vmax.f32 %v332_v19, 0.0  ;;  %v186_v24 = vmul.f32 %v179_v15, %v173_v18 }
 0x11d   :  { %v337_v25 = vmax.f32 %v334_v22, 0.0  ;;  %v187_v26 = vmul.f32 %v183_v13, %v174_v21 }
 0x11e   :  { %v338_v27 = vmul.f32 %v336_v23, %v179_v15  ;;  %v189_v28 = vsel %vm188_vm0, %v186_v24, 0.0 }
 0x11f   :  { %v339_v29 = vmul.f32 %v337_v25, %v183_v13  ;;  %v191_v30 = vsel %vm190_vm1, %v187_v26, 0.0 }
 0x120   :  { %v192_v31 = vadd.f32 %v191_v30, %v189_v28  ;;  %v340_v32 = vsel %vm188_vm0, %v338_v27, 0.0 }
 0x121   :  { %v341_v33 = vsel %vm190_vm1, %v339_v29, 0.0 }
 0x122   :  { %193 = vadd.xlane.f32.xlu0 %v192_v31  ;;  %v342_v54 = vadd.f32 %v341_v33, %v340_v32 }
 0x126   :  { %343 = vadd.xlane.f32.xlu0 %v342_v54 }
 0x1af   :  { %v194_v34 = vpop.xlane.xlu0 %193 }
 0x1b0   :  { %v196_v35 = vadd.f32 %v195_v3, %v194_v34 }
 0x1b2   :  { %544 = vtanh.f32 %v196_v35 }
 0x1b3   :  { %v344_v36 = vpop.xlane.xlu0 %343 }
 0x1b4   :  { %v345_v37 = vadd.f32 %v344_v36, %v195_v3 }
 0x1b6   :  { %546 = vtanh.f32 %v345_v37 }
 0x1bc   :  { %v545_v38 = vpop.eup %544 }
 0x1bd   :  { %199 = vst.msk [vmem:[%s997_s5] sm:$0x1] %vm198_vm2, %v545_v38 }
 0x1c0   :  { %v547_v39 = vpop.eup %546 }
 0x1c1   :  { %347 = vst.msk [vmem:[%s997_s5 + $0x1] sm:$0x1] %vm198_vm2, %v547_v39 }

</bundles_post_ra>
